<compile_context>
chip_gen: v7x
topology: tpu7x:2x2x1
jax: 0.10.0
libtpu: 0.0.40
codegen_flags: <defaults>
</compile_context>

<pallas_src>
import math

import jax
import jax.numpy as jnp
from jax import lax
from jax.experimental import pallas as pl
from jax.experimental.pallas import tpu as pltpu

_C1 = 0.01 ** 2
_C2 = 0.03 ** 2


def _make_ssim_kernel(plane_w: int):
    """Kernel over a (H, P*plane_w) block: P image planes packed along lanes."""

    def kernel(x_ref, y_ref, out_ref):
        x = x_ref[...].astype(jnp.float32)   # cast in-kernel (no wrapper pass)
        y = y_ref[...].astype(jnp.float32)
        h, wt = x.shape
        w = plane_w

        # --- hoisted boundary masks (computed once, reused everywhere) ------
        col = lax.broadcasted_iota(jnp.int32, (h, wt), 1)
        if (w & (w - 1)) == 0:                      # power-of-two plane width
            cmod = jnp.bitwise_and(col, w - 1)
        else:
            cmod = col % w
        col_first = cmod == 0
        col_last = cmod == (w - 1)
        row = lax.broadcasted_iota(jnp.int32, (h, wt), 0)
        row_first = row == 0
        row_last = row == (h - 1)

        def shift_cols(a):
            # Per-plane left/right neighbours with reflect padding.  Lane rolls
            # wrap across plane boundaries, but every wrap position coincides
            # with a plane edge and is overwritten by the select.
            rl = pltpu.roll(a, 1, axis=1)        # a[:, j-1] (wrapped)
            rr = pltpu.roll(a, wt - 1, axis=1)   # a[:, j+1] (wrapped)
            left = jnp.where(col_first, rr, rl)   # reflect: col 0   -> col 1
            right = jnp.where(col_last, rl, rr)   # reflect: col W-1 -> col W-2
            return left, right

        def vsum3(s):
            # 3-tap vertical sum with reflect padding on the row (sublane) axis.
            up = jnp.where(row_first, s[1:2, :], pltpu.roll(s, 1, axis=0))
            down = jnp.where(row_last, s[h - 2:h - 1, :],
                             pltpu.roll(s, h - 1, axis=0))
            return up + s + down

        xl, xr = shift_cols(x)
        yl, yr = shift_cols(y)

        inv9 = jnp.float32(1.0 / 9.0)
        mu_x = vsum3(xl + x + xr) * inv9
        mu_y = vsum3(yl + y + yr) * inv9
        e_x2 = vsum3(xl * xl + x * x + xr * xr) * inv9
        e_y2 = vsum3(yl * yl + y * y + yr * yr) * inv9
        e_xy = vsum3(xl * yl + x * y + xr * yr) * inv9

        sigma_x = e_x2 - mu_x * mu_x
        sigma_y = e_y2 - mu_y * mu_y
        sigma_xy = e_xy - mu_x * mu_y

        ssim_n = (2.0 * mu_x * mu_y + _C1) * (2.0 * sigma_xy + _C2)
        ssim_d = (mu_x * mu_x + mu_y * mu_y + _C1) * (sigma_x + sigma_y + _C2)
        # approx=False keeps the 1e-5 reference tolerance; approx=True would
        # move the reciprocal to the idle EUP slot (~2^-12 rel. error).
        out = jnp.clip((1.0 - ssim_n * pl.reciprocal(ssim_d, approx=False))
                       * 0.5, 0.0, 1.0)
        out_ref[...] = out.astype(out_ref.dtype)   # single lane-dense store

    return kernel


def make_ssim(batch: int, channels: int, height: int, width: int):
    """Returns ssim(x, y) for a fixed (B, C, H, W), mirroring SSIM.forward."""
    assert height >= 2 and width >= 2, "SSIM reflect-pad(1) needs H, W >= 2"
    bc = batch * channels
    H, W = height, width
    total_w = bc * W

    # Planes packed along the lane axis.  Pick P (planes per grid step) so the
    # packed width P*W is a multiple of 128 lanes, then grow P to amortise the
    # ~0.35 us/step pipeline overhead while each input block stays well inside
    # VMEM on every generation (v7x: 64 MiB physical / 32 MiB scoped).
    p = 128 // math.gcd(W, 128)
    if bc % p != 0:
        p = bc                                   # single step, full width
    else:
        max_block_bytes = 1 << 20                # 1 MiB per input block (f32)
        while bc % (2 * p) == 0 and H * (2 * p) * W * 4 <= max_block_bytes:
            p *= 2
    pw = p * W
    g = bc // p

    kernel = _make_ssim_kernel(W)

    grid_spec = pltpu.PrefetchScalarGridSpec(
        num_scalar_prefetch=0,
        grid=(g,),
        in_specs=[
            pl.BlockSpec((H, pw), lambda i: (0, i)),   # x planes
            pl.BlockSpec((H, pw), lambda i: (0, i)),   # y planes
        ],
        out_specs=pl.BlockSpec((H, pw), lambda i: (0, i)),
    )

    call = pl.pallas_call(
        kernel,
        out_shape=jax.ShapeDtypeStruct((H, total_w), jnp.float32),
        grid_spec=grid_spec,
        compiler_params=pltpu.CompilerParams(
            dimension_semantics=("parallel",),
            vmem_limit_bytes=28 * 1024 * 1024,   # safe on v5e/v6e/v7x
        ),
    )

    @jax.jit
    def ssim(x, y):
        assert x.shape == (batch, channels, H, W) and y.shape == x.shape
        # Layout plumbing only: pack the B*C planes along the lane axis so the
        # kernel sees a lane-dense last dimension; inputs keep their dtype.
        def pack(a):
            a = a.reshape(bc, H, W)
            a = jnp.transpose(a, (1, 0, 2))
            return a.reshape(H, total_w)

        out = call(pack(x), pack(y))
        out = out.reshape(H, bc, W)
        out = jnp.transpose(out, (1, 0, 2)).reshape(batch, channels, H, W)
        return out.astype(x.dtype)

    return ssim


if __name__ == "__main__":
    B, C, H, W = 2, 4, 16, 16
    key = jax.random.PRNGKey(0)
    kx, ky = jax.random.split(key)
    x = jax.random.uniform(kx, (B, C, H, W), jnp.float32)
    y = jnp.clip(x + 0.1 * jax.random.normal(ky, (B, C, H, W), jnp.float32),
                 0.0, 1.0)

    ssim = make_ssim(B, C, H, W)
    out = jax.block_until_ready(ssim(x, y))

    # Pure-JAX reference (same math as the PyTorch forward).
    def ref_ssim(x, y):
        pad = lambda a: jnp.pad(a, ((0, 0), (0, 0), (1, 1), (1, 1)),
                                mode="reflect")
        xp, yp = pad(x), pad(y)

        def pool(a):
            s = jnp.zeros((B, C, H, W), jnp.float32)
            for di in range(3):
                for dj in range(3):
                    s = s + a[:, :, di:di + H, dj:dj + W]
            return s / 9.0

        mu_x, mu_y = pool(xp), pool(yp)
        sigma_x = pool(xp * xp) - mu_x * mu_x
        sigma_y = pool(yp * yp) - mu_y * mu_y
        sigma_xy = pool(xp * yp) - mu_x * mu_y
        n = (2 * mu_x * mu_y + _C1) * (2 * sigma_xy + _C2)
        d = (mu_x ** 2 + mu_y ** 2 + _C1) * (sigma_x + sigma_y + _C2)
        return jnp.clip((1 - n / d) / 2, 0.0, 1.0)

    ref = ref_ssim(x, y)
    assert out.shape == (B, C, H, W)
    assert jnp.allclose(out, ref, atol=1e-5, rtol=1e-5), float(
        jnp.max(jnp.abs(out - ref)))

    print("KERNEL_OK")
</pallas_src>

<mosaic_0001>
module attributes {stable_mosaic.version = 11 : i64} {
  func.func @kernel(%arg0: i32, %arg1: memref<16x128xf32, #tpu.memory_space<vmem>>, %arg2: memref<16x128xf32, #tpu.memory_space<vmem>>, %arg3: memref<16x128xf32, #tpu.memory_space<vmem>>) attributes {dimension_semantics = [#tpu.dimension_semantics<parallel>], iteration_bounds = array<i64: 1>, scalar_prefetch = 0 : i64, scratch_operands = 0 : i64, tpu.core_type = #tpu.core_type<tc>, window_params = [{transform_indices = @transform_0, window_bounds = array<i64: 16, 128>}, {transform_indices = @transform_1, window_bounds = array<i64: 16, 128>}, {transform_indices = @transform_2, window_bounds = array<i64: 16, 128>}]} {
    %c0 = arith.constant 0 : index
    %c0_0 = arith.constant 0 : index
    %0 = vector.load %arg1[%c0, %c0_0] : memref<16x128xf32, #tpu.memory_space<vmem>>, vector<16x128xf32>
    %c0_1 = arith.constant 0 : index
    %c0_2 = arith.constant 0 : index
    %1 = vector.load %arg2[%c0_1, %c0_2] : memref<16x128xf32, #tpu.memory_space<vmem>>, vector<16x128xf32>
    %2 = tpu.iota {dimensions = array<i32: 1>} : vector<16x128xi32>
    %c15_i32 = arith.constant 15 : i32
    %3 = vector.broadcast %c15_i32 : i32 to vector<16x128xi32>
    %4 = arith.andi %2, %3 : vector<16x128xi32>
    %c0_i32 = arith.constant 0 : i32
    %5 = vector.broadcast %c0_i32 : i32 to vector<16x128xi32>
    %6 = arith.cmpi eq, %4, %5 : vector<16x128xi32>
    %c15_i32_3 = arith.constant 15 : i32
    %7 = vector.broadcast %c15_i32_3 : i32 to vector<16x128xi32>
    %8 = arith.cmpi eq, %4, %7 : vector<16x128xi32>
    %9 = tpu.iota {dimensions = array<i32: 0>} : vector<16x128xi32>
    %c0_i32_4 = arith.constant 0 : i32
    %10 = vector.broadcast %c0_i32_4 : i32 to vector<16x128xi32>
    %11 = arith.cmpi eq, %9, %10 : vector<16x128xi32>
    %c15_i32_5 = arith.constant 15 : i32
    %12 = vector.broadcast %c15_i32_5 : i32 to vector<16x128xi32>
    %13 = arith.cmpi eq, %9, %12 : vector<16x128xi32>
    %c1_i32 = arith.constant 1 : i32
    %14 = tpu.dynamic_rotate %0 by %c1_i32 dim 1 : vector<16x128xf32>, i32 -> vector<16x128xf32>
    %c127_i32 = arith.constant 127 : i32
    %15 = tpu.dynamic_rotate %0 by %c127_i32 dim 1 : vector<16x128xf32>, i32 -> vector<16x128xf32>
    %16 = arith.select %6, %15, %14 : vector<16x128xi1>, vector<16x128xf32>
    %17 = arith.select %8, %14, %15 : vector<16x128xi1>, vector<16x128xf32>
    %c1_i32_6 = arith.constant 1 : i32
    %18 = tpu.dynamic_rotate %1 by %c1_i32_6 dim 1 : vector<16x128xf32>, i32 -> vector<16x128xf32>
    %c127_i32_7 = arith.constant 127 : i32
    %19 = tpu.dynamic_rotate %1 by %c127_i32_7 dim 1 : vector<16x128xf32>, i32 -> vector<16x128xf32>
    %20 = arith.select %6, %19, %18 : vector<16x128xi1>, vector<16x128xf32>
    %21 = arith.select %8, %18, %19 : vector<16x128xi1>, vector<16x128xf32>
    %22 = arith.addf %16, %0 : vector<16x128xf32>
    %23 = arith.addf %22, %17 : vector<16x128xf32>
    %24 = vector.extract_strided_slice %23 {offsets = [1, 0], sizes = [1, 128], strides = [1, 1]} : vector<16x128xf32> to vector<1x128xf32>
    %c1_i32_8 = arith.constant 1 : i32
    %25 = tpu.dynamic_rotate %23 by %c1_i32_8 dim 0 : vector<16x128xf32>, i32 -> vector<16x128xf32>
    %26 = vector.shape_cast %24 : vector<1x128xf32> to vector<1x128xf32>
    %27 = vector.broadcast %26 : vector<1x128xf32> to vector<16x128xf32>
    %28 = arith.select %11, %27, %25 : vector<16x128xi1>, vector<16x128xf32>
    %29 = vector.extract_strided_slice %23 {offsets = [14, 0], sizes = [1, 128], strides = [1, 1]} : vector<16x128xf32> to vector<1x128xf32>
    %c15_i32_9 = arith.constant 15 : i32
    %30 = tpu.dynamic_rotate %23 by %c15_i32_9 dim 0 : vector<16x128xf32>, i32 -> vector<16x128xf32>
    %31 = vector.shape_cast %29 : vector<1x128xf32> to vector<1x128xf32>
    %32 = vector.broadcast %31 : vector<1x128xf32> to vector<16x128xf32>
    %33 = arith.select %13, %32, %30 : vector<16x128xi1>, vector<16x128xf32>
    %34 = arith.addf %28, %23 : vector<16x128xf32>
    %35 = arith.addf %34, %33 : vector<16x128xf32>
    %cst = arith.constant 0.111111112 : f32
    %36 = vector.broadcast %cst : f32 to vector<16x128xf32>
    %37 = arith.mulf %35, %36 : vector<16x128xf32>
    %38 = arith.addf %20, %1 : vector<16x128xf32>
    %39 = arith.addf %38, %21 : vector<16x128xf32>
    %40 = vector.extract_strided_slice %39 {offsets = [1, 0], sizes = [1, 128], strides = [1, 1]} : vector<16x128xf32> to vector<1x128xf32>
    %c1_i32_10 = arith.constant 1 : i32
    %41 = tpu.dynamic_rotate %39 by %c1_i32_10 dim 0 : vector<16x128xf32>, i32 -> vector<16x128xf32>
    %42 = vector.shape_cast %40 : vector<1x128xf32> to vector<1x128xf32>
    %43 = vector.broadcast %42 : vector<1x128xf32> to vector<16x128xf32>
    %44 = arith.select %11, %43, %41 : vector<16x128xi1>, vector<16x128xf32>
    %45 = vector.extract_strided_slice %39 {offsets = [14, 0], sizes = [1, 128], strides = [1, 1]} : vector<16x128xf32> to vector<1x128xf32>
    %c15_i32_11 = arith.constant 15 : i32
    %46 = tpu.dynamic_rotate %39 by %c15_i32_11 dim 0 : vector<16x128xf32>, i32 -> vector<16x128xf32>
    %47 = vector.shape_cast %45 : vector<1x128xf32> to vector<1x128xf32>
    %48 = vector.broadcast %47 : vector<1x128xf32> to vector<16x128xf32>
    %49 = arith.select %13, %48, %46 : vector<16x128xi1>, vector<16x128xf32>
    %50 = arith.addf %44, %39 : vector<16x128xf32>
    %51 = arith.addf %50, %49 : vector<16x128xf32>
    %cst_12 = arith.constant 0.111111112 : f32
    %52 = vector.broadcast %cst_12 : f32 to vector<16x128xf32>
    %53 = arith.mulf %51, %52 : vector<16x128xf32>
    %54 = arith.mulf %16, %16 : vector<16x128xf32>
    %55 = arith.mulf %0, %0 : vector<16x128xf32>
    %56 = arith.addf %54, %55 : vector<16x128xf32>
    %57 = arith.mulf %17, %17 : vector<16x128xf32>
    %58 = arith.addf %56, %57 : vector<16x128xf32>
    %59 = vector.extract_strided_slice %58 {offsets = [1, 0], sizes = [1, 128], strides = [1, 1]} : vector<16x128xf32> to vector<1x128xf32>
    %c1_i32_13 = arith.constant 1 : i32
    %60 = tpu.dynamic_rotate %58 by %c1_i32_13 dim 0 : vector<16x128xf32>, i32 -> vector<16x128xf32>
    %61 = vector.shape_cast %59 : vector<1x128xf32> to vector<1x128xf32>
    %62 = vector.broadcast %61 : vector<1x128xf32> to vector<16x128xf32>
    %63 = arith.select %11, %62, %60 : vector<16x128xi1>, vector<16x128xf32>
    %64 = vector.extract_strided_slice %58 {offsets = [14, 0], sizes = [1, 128], strides = [1, 1]} : vector<16x128xf32> to vector<1x128xf32>
    %c15_i32_14 = arith.constant 15 : i32
    %65 = tpu.dynamic_rotate %58 by %c15_i32_14 dim 0 : vector<16x128xf32>, i32 -> vector<16x128xf32>
    %66 = vector.shape_cast %64 : vector<1x128xf32> to vector<1x128xf32>
    %67 = vector.broadcast %66 : vector<1x128xf32> to vector<16x128xf32>
    %68 = arith.select %13, %67, %65 : vector<16x128xi1>, vector<16x128xf32>
    %69 = arith.addf %63, %58 : vector<16x128xf32>
    %70 = arith.addf %69, %68 : vector<16x128xf32>
    %cst_15 = arith.constant 0.111111112 : f32
    %71 = vector.broadcast %cst_15 : f32 to vector<16x128xf32>
    %72 = arith.mulf %70, %71 : vector<16x128xf32>
    %73 = arith.mulf %20, %20 : vector<16x128xf32>
    %74 = arith.mulf %1, %1 : vector<16x128xf32>
    %75 = arith.addf %73, %74 : vector<16x128xf32>
    %76 = arith.mulf %21, %21 : vector<16x128xf32>
    %77 = arith.addf %75, %76 : vector<16x128xf32>
    %78 = vector.extract_strided_slice %77 {offsets = [1, 0], sizes = [1, 128], strides = [1, 1]} : vector<16x128xf32> to vector<1x128xf32>
    %c1_i32_16 = arith.constant 1 : i32
    %79 = tpu.dynamic_rotate %77 by %c1_i32_16 dim 0 : vector<16x128xf32>, i32 -> vector<16x128xf32>
    %80 = vector.shape_cast %78 : vector<1x128xf32> to vector<1x128xf32>
    %81 = vector.broadcast %80 : vector<1x128xf32> to vector<16x128xf32>
    %82 = arith.select %11, %81, %79 : vector<16x128xi1>, vector<16x128xf32>
    %83 = vector.extract_strided_slice %77 {offsets = [14, 0], sizes = [1, 128], strides = [1, 1]} : vector<16x128xf32> to vector<1x128xf32>
    %c15_i32_17 = arith.constant 15 : i32
    %84 = tpu.dynamic_rotate %77 by %c15_i32_17 dim 0 : vector<16x128xf32>, i32 -> vector<16x128xf32>
    %85 = vector.shape_cast %83 : vector<1x128xf32> to vector<1x128xf32>
    %86 = vector.broadcast %85 : vector<1x128xf32> to vector<16x128xf32>
    %87 = arith.select %13, %86, %84 : vector<16x128xi1>, vector<16x128xf32>
    %88 = arith.addf %82, %77 : vector<16x128xf32>
    %89 = arith.addf %88, %87 : vector<16x128xf32>
    %cst_18 = arith.constant 0.111111112 : f32
    %90 = vector.broadcast %cst_18 : f32 to vector<16x128xf32>
    %91 = arith.mulf %89, %90 : vector<16x128xf32>
    %92 = arith.mulf %16, %20 : vector<16x128xf32>
    %93 = arith.mulf %0, %1 : vector<16x128xf32>
    %94 = arith.addf %92, %93 : vector<16x128xf32>
    %95 = arith.mulf %17, %21 : vector<16x128xf32>
    %96 = arith.addf %94, %95 : vector<16x128xf32>
    %97 = vector.extract_strided_slice %96 {offsets = [1, 0], sizes = [1, 128], strides = [1, 1]} : vector<16x128xf32> to vector<1x128xf32>
    %c1_i32_19 = arith.constant 1 : i32
    %98 = tpu.dynamic_rotate %96 by %c1_i32_19 dim 0 : vector<16x128xf32>, i32 -> vector<16x128xf32>
    %99 = vector.shape_cast %97 : vector<1x128xf32> to vector<1x128xf32>
    %100 = vector.broadcast %99 : vector<1x128xf32> to vector<16x128xf32>
    %101 = arith.select %11, %100, %98 : vector<16x128xi1>, vector<16x128xf32>
    %102 = vector.extract_strided_slice %96 {offsets = [14, 0], sizes = [1, 128], strides = [1, 1]} : vector<16x128xf32> to vector<1x128xf32>
    %c15_i32_20 = arith.constant 15 : i32
    %103 = tpu.dynamic_rotate %96 by %c15_i32_20 dim 0 : vector<16x128xf32>, i32 -> vector<16x128xf32>
    %104 = vector.shape_cast %102 : vector<1x128xf32> to vector<1x128xf32>
    %105 = vector.broadcast %104 : vector<1x128xf32> to vector<16x128xf32>
    %106 = arith.select %13, %105, %103 : vector<16x128xi1>, vector<16x128xf32>
    %107 = arith.addf %101, %96 : vector<16x128xf32>
    %108 = arith.addf %107, %106 : vector<16x128xf32>
    %cst_21 = arith.constant 0.111111112 : f32
    %109 = vector.broadcast %cst_21 : f32 to vector<16x128xf32>
    %110 = arith.mulf %108, %109 : vector<16x128xf32>
    %111 = arith.mulf %37, %37 : vector<16x128xf32>
    %112 = arith.subf %72, %111 : vector<16x128xf32>
    %113 = arith.mulf %53, %53 : vector<16x128xf32>
    %114 = arith.subf %91, %113 : vector<16x128xf32>
    %115 = arith.mulf %37, %53 : vector<16x128xf32>
    %116 = arith.subf %110, %115 : vector<16x128xf32>
    %cst_22 = arith.constant 2.000000e+00 : f32
    %117 = vector.broadcast %cst_22 : f32 to vector<16x128xf32>
    %118 = arith.mulf %117, %37 : vector<16x128xf32>
    %119 = arith.mulf %118, %53 : vector<16x128xf32>
    %cst_23 = arith.constant 9.99999974E-5 : f32
    %120 = vector.broadcast %cst_23 : f32 to vector<16x128xf32>
    %121 = arith.addf %119, %120 : vector<16x128xf32>
    %cst_24 = arith.constant 2.000000e+00 : f32
    %122 = vector.broadcast %cst_24 : f32 to vector<16x128xf32>
    %123 = arith.mulf %122, %116 : vector<16x128xf32>
    %cst_25 = arith.constant 8.99999984E-4 : f32
    %124 = vector.broadcast %cst_25 : f32 to vector<16x128xf32>
    %125 = arith.addf %123, %124 : vector<16x128xf32>
    %126 = arith.mulf %121, %125 : vector<16x128xf32>
    %127 = arith.mulf %37, %37 : vector<16x128xf32>
    %128 = arith.mulf %53, %53 : vector<16x128xf32>
    %129 = arith.addf %127, %128 : vector<16x128xf32>
    %cst_26 = arith.constant 9.99999974E-5 : f32
    %130 = vector.broadcast %cst_26 : f32 to vector<16x128xf32>
    %131 = arith.addf %129, %130 : vector<16x128xf32>
    %132 = arith.addf %112, %114 : vector<16x128xf32>
    %cst_27 = arith.constant 8.99999984E-4 : f32
    %133 = vector.broadcast %cst_27 : f32 to vector<16x128xf32>
    %134 = arith.addf %132, %133 : vector<16x128xf32>
    %135 = arith.mulf %131, %134 : vector<16x128xf32>
    %136 = tpu.reciprocal %135 : vector<16x128xf32> -> vector<16x128xf32>
    %137 = arith.mulf %126, %136 : vector<16x128xf32>
    %cst_28 = arith.constant 1.000000e+00 : f32
    %138 = vector.broadcast %cst_28 : f32 to vector<16x128xf32>
    %139 = arith.subf %138, %137 : vector<16x128xf32>
    %cst_29 = arith.constant 5.000000e-01 : f32
    %140 = vector.broadcast %cst_29 : f32 to vector<16x128xf32>
    %141 = arith.mulf %139, %140 : vector<16x128xf32>
    %cst_30 = arith.constant 0.000000e+00 : f32
    %cst_31 = arith.constant 1.000000e+00 : f32
    %142 = vector.broadcast %cst_30 : f32 to vector<16x128xf32>
    %143 = arith.maximumf %142, %141 : vector<16x128xf32>
    %144 = vector.broadcast %cst_31 : f32 to vector<16x128xf32>
    %145 = arith.minimumf %144, %143 : vector<16x128xf32>
    %c0_32 = arith.constant 0 : index
    %c0_33 = arith.constant 0 : index
    %146 = vector.load %arg3[%c0_32, %c0_33] : memref<16x128xf32, #tpu.memory_space<vmem>>, vector<16x128xf32>
    tpu.vector_store %arg3[%c0_32, %c0_33], %145 {strides = array<i32>} : memref<16x128xf32, #tpu.memory_space<vmem>>, vector<16x128xf32>,
    return
  }
  func.func @transform_0(%arg0: i32) -> (i32, i32) {
    %c0_i32 = arith.constant 0 : i32
    %c0_i32_0 = arith.constant 0 : i32
    return %c0_i32, %arg0 : i32, i32
  }
  func.func @transform_1(%arg0: i32) -> (i32, i32) {
    %c0_i32 = arith.constant 0 : i32
    %c0_i32_0 = arith.constant 0 : i32
    return %c0_i32, %arg0 : i32, i32
  }
  func.func @transform_2(%arg0: i32) -> (i32, i32) {
    %c0_i32 = arith.constant 0 : i32
    %c0_i32_0 = arith.constant 0 : i32
    return %c0_i32, %arg0 : i32, i32
  }
}

</mosaic_0001>

<bundles_post_ra>
// kernel: ssim.1
= control target key start
LH: loop header
LB: loop body
LE: loop exit
PB: predicated region body
PF: predicated region fallthrough
CT: control target
= control target key end

     0   :  { %s279_s11 = smov 127   ;;  %s280_s12 = smov 1   ;;  %v15_v4 = vlaneseq  ;;  %s505_s0 = inlined_call_operand.vmem [shape: f32[16,128], index: 0, kind: input, shape index: {}]   ;;  %s506_s1 = inlined_call_operand.vmem [shape: f32[16,128], index: 1, kind: input, shape index: {}]   ;;  %s507_s2 = inlined_call_operand.vmem [shape: f32[16,128], index: 2, kind: output, shape index: {}]  }
   0x1   :  { %v299_v0 = vld [vmem:[%s505_s0] sm:$0xff]  ;;  %v306_v1 = vld [vmem:[%s505_s0 + $0x8] sm:$0xff] }
   0x2   :  { %31 = vrot.lane.b32.xlu1 %v299_v0, %s279_s11  ;;  %27 = vrot.lane.b32.xlu0 %v299_v0, %s280_s12  ;;  %v313_v2 = vld [vmem:[%s506_s1 + $0x8] sm:$0xff]  ;;  %v318_v3 = vld [vmem:[%s506_s1] sm:$0xff]  ;;  %v16_v5 = vand.u32 127, %v15_v4  ;;  %v115_v11 = vmul.f32 %v299_v0, %v299_v0  ;;  %v346_v16 = vshrl.u32 %v15_v4, 7  ;;  %v116_v20 = vmul.f32 %v306_v1, %v306_v1 }
   0x4   :  { %v17_v6 = vand.u32 15, %v16_v5  ;;  %v356_v24 = vadd.s32 8, %v346_v16  ;;  %v363_v26 = vsub.s32 6, %v346_v16  ;;  %vm57_vm2 = vcmp.lt.s32.totalorder %v346_v16, 1 }
   0x5   :  { %v368_v29 = vsub.s32 1, %v346_v16  ;;  %vm68_vm3 = vcmp.lt.s32.totalorder %v346_v16, 7  ;;  %vm23_vm4 = vcmp.eq.s32.totalorder %v346_v16, 0  ;;  %v152_v5 = vmul.f32 %v313_v2, %v313_v2 }
   0x6   :  { %33 = vrot.lane.b32.xlu1 %v306_v1, %s279_s11  ;;  %29 = vrot.lane.b32.xlu0 %v306_v1, %s280_s12  ;;  %vm324_vm0 = vcmp.eq.s32.totalorder %v17_v6, 0  ;;  %vm328_vm1 = vcmp.eq.s32.totalorder %v17_v6, 15  ;;  %vm26_vm5 = vcmp.eq.s32.totalorder %v356_v24, 15 }
   0xa   :  { %41 = vrot.lane.b32.xlu1 %v313_v2, %s280_s12  ;;  %39 = vrot.lane.b32.xlu0 %v318_v3, %s280_s12 }
   0xe   :  { %45 = vrot.lane.b32.xlu1 %v313_v2, %s279_s11  ;;  %43 = vrot.lane.b32.xlu0 %v318_v3, %s279_s11 }
  0x74   :  { %v32_v8 = vpop.permute.xlu1 %31  ;;  %v28_v10 = vpop.permute.xlu0 %27 }
  0x75   :  { %v336_v12 = vsel %vm324_vm0, %v32_v8, %v28_v10  ;;  %v344_v15 = vsel %vm328_vm1, %v28_v10, %v32_v8 }
  0x76   :  { %v51_v13 = vadd.f32 %v336_v12, %v299_v0  ;;  %v113_v14 = vmul.f32 %v336_v12, %v336_v12  ;;  %v119_v23 = vmul.f32 %v344_v15, %v344_v15 }
  0x78   :  { %v117_v17 = vadd.f32 %v115_v11, %v113_v14  ;;  %v34_v18 = vpop.permute.xlu1 %33  ;;  %v30_v19 = vpop.permute.xlu0 %29  ;;  %v53_v22 = vadd.f32 %v51_v13, %v344_v15 }
  0x79   :  { %v36_v21 = vsel %vm324_vm0, %v34_v18, %v30_v19  ;;  %v360_v25 = vsel %vm328_vm1, %v30_v19, %v34_v18 }
  0x7a   :  { %v52_v27 = vadd.f32 %v36_v21, %v306_v1  ;;  %v114_v28 = vmul.f32 %v36_v21, %v36_v21  ;;  %v121_v30 = vadd.f32 %v119_v23, %v117_v17  ;;  %v120_v34 = vmul.f32 %v360_v25, %v360_v25 }
  0x7b   :  { %v55_v35 = vrot.slane %v53_v22, 7  ;;  %v66_v36 = vrot.slane %v53_v22, 1  ;;  %v63_v41 = vrot.slane %v53_v22, %v368_v29 }
  0x7c   :  { %v42_v31 = vpop.permute.xlu1 %41  ;;  %v54_v32 = vadd.f32 %v52_v27, %v360_v25  ;;  %v118_v33 = vadd.f32 %v116_v20, %v114_v28  ;;  %v123_v42 = vrot.slane %v121_v30, 7  ;;  %v130_v43 = vrot.slane %v121_v30, %v368_v29  ;;  %v40_v57 = vpop.permute.xlu0 %39 }
  0x7d   :  { %v133_v44 = vrot.slane %v121_v30, 1  ;;  %v188_v20 = vmul.f32 %v313_v2, %v306_v1 }
  0x7e   :  { %v56_v37 = vrot.slane %v54_v32, 7  ;;  %v67_v38 = vrot.slane %v54_v32, 1  ;;  %v74_v39 = vrot.slane %v54_v32, %v363_v26  ;;  %v122_v40 = vadd.f32 %v120_v34, %v118_v33 }
  0x7f   :  { %v151_v33 = vmul.f32 %v318_v3, %v318_v3  ;;  %v187_v34 = vmul.f32 %v318_v3, %v299_v0 }
  0x80   :  { %v58_v45 = vsel %vm57_vm2, %v55_v35, %v56_v37  ;;  %v59_v46 = vsel %vm57_vm2, %v56_v37, %v55_v35  ;;  %v70_v47 = vsel %vm68_vm3, %v67_v38, %v66_v36  ;;  %v46_v48 = vpop.permute.xlu1 %45  ;;  %v124_v52 = vrot.slane %v122_v40, 7 }
  0x81   :  { %v64_v49 = vsel %vm23_vm4, %v63_v41, %v59_v46  ;;  %v76_v50 = vsel %vm26_vm5, %v74_v39, %v70_v47  ;;  %v78_v51 = vadd.f32 %v58_v45, %v54_v32  ;;  %v69_v53 = vsel %vm68_vm3, %v66_v36, %v67_v38 }
  0x82   :  { %v77_v54 = vadd.f32 %v64_v49, %v53_v22  ;;  %v134_v55 = vrot.slane %v122_v40, 1  ;;  %v140_v56 = vrot.slane %v122_v40, %v363_v26  ;;  %v125_v59 = vsel %vm57_vm2, %v123_v42, %v124_v52 }
  0x83   :  { %v80_v58 = vadd.f32 %v78_v51, %v76_v50  ;;  %v126_v60 = vsel %vm57_vm2, %v124_v52, %v123_v42  ;;  %v48_v61 = vsel %vm324_vm0, %v46_v48, %v42_v31  ;;  %v144_v10 = vadd.f32 %v125_v59, %v122_v40 }
  0x84   :  { %v79_v62 = vadd.f32 %v77_v54, %v69_v53  ;;  %v131_v63 = vsel %vm23_vm4, %v130_v43, %v126_v60  ;;  %v136_v4 = vsel %vm68_vm3, %v134_v55, %v133_v44  ;;  %v50_v11 = vsel %vm328_vm1, %v42_v31, %v46_v48 }
  0x85   :  { %v142_v6 = vsel %vm26_vm5, %v140_v56, %v136_v4  ;;  %v143_v8 = vadd.f32 %v131_v63, %v121_v30  ;;  %v84_v13 = vadd.f32 %v48_v61, %v313_v2  ;;  %v150_v14 = vmul.f32 %v48_v61, %v48_v61  ;;  %v44_v30 = vpop.permute.xlu0 %43 }
  0x86   :  { %v409_v17 = vmul.f32 0.11111111, %v79_v62  ;;  %v411_v18 = vmul.f32 0.11111111, %v80_v58  ;;  %v135_v19 = vsel %vm68_vm3, %v133_v44, %v134_v55  ;;  %v146_v23 = vadd.f32 %v144_v10, %v142_v6 }
  0x87   :  { %v145_v22 = vadd.f32 %v143_v8, %v135_v19  ;;  %v154_v27 = vadd.f32 %v152_v5, %v150_v14  ;;  %v186_v28 = vmul.f32 %v48_v61, %v36_v21  ;;  %v156_v32 = vmul.f32 %v50_v11, %v50_v11 }
  0x88   :  { %v86_v31 = vadd.f32 %v84_v13, %v50_v11  ;;  %v192_v37 = vmul.f32 %v50_v11, %v360_v25  ;;  %v47_v1 = vsel %vm324_vm0, %v44_v30, %v40_v57  ;;  %v426_v38 = vmul.f32 0.11111111, %v146_v23 }
  0x89   :  { %v158_v35 = vadd.f32 %v156_v32, %v154_v27  ;;  %v190_v36 = vadd.f32 %v188_v20, %v186_v28  ;;  %v424_v2 = vmul.f32 0.11111111, %v145_v22  ;;  %v430_v21 = vmul.f32 %v409_v17, %v409_v17 }
  0x8a   :  { %v434_v39 = vmul.f32 %v411_v18, %v411_v18  ;;  %v49_v25 = vsel %vm328_vm1, %v40_v57, %v44_v30  ;;  %v83_v7 = vadd.f32 %v47_v1, %v318_v3  ;;  %v149_v40 = vmul.f32 %v47_v1, %v47_v1 }
  0x8b   :  { %v436_v0 = vadd.f32 %v192_v37, %v190_v36  ;;  %v88_v41 = vrot.slane %v86_v31, 7  ;;  %v98_v42 = vrot.slane %v86_v31, 1  ;;  %v104_v43 = vrot.slane %v86_v31, %v363_v26 }
  0x8c   :  { %v185_v44 = vmul.f32 %v47_v1, %v336_v12  ;;  %v160_v45 = vrot.slane %v158_v35, 7  ;;  %v170_v46 = vrot.slane %v158_v35, 1  ;;  %v176_v47 = vrot.slane %v158_v35, %v363_v26 }
  0x8d   :  { %v85_v48 = vadd.f32 %v83_v7, %v49_v25  ;;  %v153_v49 = vadd.f32 %v151_v33, %v149_v40  ;;  %v155_v50 = vmul.f32 %v49_v25, %v49_v25  ;;  %v191_v9 = vmul.f32 %v49_v25, %v344_v15 }
  0x8e   :  { %v189_v51 = vadd.f32 %v187_v34, %v185_v44  ;;  %v196_v52 = vrot.slane %v436_v0, 7  ;;  %v206_v55 = vrot.slane %v436_v0, 1  ;;  %v212_v12 = vrot.slane %v436_v0, %v363_v26 }
  0x8f   :  { %v87_v3 = vrot.slane %v85_v48, 7  ;;  %v94_v53 = vrot.slane %v85_v48, %v368_v29  ;;  %v97_v54 = vrot.slane %v85_v48, 1  ;;  %v157_v56 = vadd.f32 %v155_v50, %v153_v49 }
  0x90   :  { %v193_v57 = vadd.f32 %v191_v9, %v189_v51 }
  0x91   :  { %v89_v58 = vsel %vm57_vm2, %v87_v3, %v88_v41  ;;  %v90_v59 = vsel %vm57_vm2, %v88_v41, %v87_v3  ;;  %v99_v15 = vsel %vm68_vm3, %v97_v54, %v98_v42  ;;  %v100_v60 = vsel %vm68_vm3, %v98_v42, %v97_v54 }
  0x92   :  { %v95_v61 = vsel %vm23_vm4, %v94_v53, %v90_v59  ;;  %v106_v26 = vsel %vm26_vm5, %v104_v43, %v100_v60  ;;  %v108_v62 = vadd.f32 %v89_v58, %v86_v31  ;;  %v159_v63 = vrot.slane %v157_v56, 7 }
  0x93   :  { %v107_v4 = vadd.f32 %v95_v61, %v85_v48  ;;  %v166_v5 = vrot.slane %v157_v56, %v368_v29  ;;  %v169_v6 = vrot.slane %v157_v56, 1  ;;  %v195_v8 = vrot.slane %v193_v57, 7 }
  0x94   :  { %v110_v10 = vadd.f32 %v108_v62, %v106_v26  ;;  %v161_v11 = vsel %vm57_vm2, %v159_v63, %v160_v45  ;;  %v162_v13 = vsel %vm57_vm2, %v160_v45, %v159_v63  ;;  %v202_v14 = vrot.slane %v193_v57, %v368_v29 }
  0x95   :  { %v109_v19 = vadd.f32 %v107_v4, %v99_v15  ;;  %v167_v20 = vsel %vm23_vm4, %v166_v5, %v162_v13  ;;  %v171_v22 = vsel %vm68_vm3, %v169_v6, %v170_v46  ;;  %v172_v23 = vsel %vm68_vm3, %v170_v46, %v169_v6 }
  0x96   :  { %v112_v27 = vmul.f32 0.11111111, %v110_v10  ;;  %v178_v28 = vsel %vm26_vm5, %v176_v47, %v172_v23  ;;  %v179_v30 = vadd.f32 %v167_v20, %v157_v56  ;;  %v180_v32 = vadd.f32 %v161_v11, %v158_v35 }
  0x97   :  { %v111_v31 = vmul.f32 0.11111111, %v109_v19  ;;  %v197_v29 = vsel %vm57_vm2, %v195_v8, %v196_v52  ;;  %v198_v33 = vsel %vm57_vm2, %v196_v52, %v195_v8  ;;  %v205_v34 = vrot.slane %v193_v57, 1 }
  0x98   :  { %v181_v36 = vadd.f32 %v179_v30, %v171_v22  ;;  %v182_v37 = vadd.f32 %v180_v32, %v178_v28  ;;  %v203_v1 = vsel %vm23_vm4, %v202_v14, %v198_v33  ;;  %v216_v25 = vadd.f32 %v197_v29, %v436_v0 }
  0x99   :  { %v207_v7 = vsel %vm68_vm3, %v205_v34, %v206_v55  ;;  %v208_v35 = vsel %vm68_vm3, %v206_v55, %v205_v34  ;;  %v215_v40 = vadd.f32 %v203_v1, %v193_v57  ;;  %v225_v41 = vmul.f32 %v111_v31, %v111_v31 }
  0x9a   :  { %v183_v42 = vmul.f32 0.11111111, %v181_v36  ;;  %v184_v43 = vmul.f32 0.11111111, %v182_v37  ;;  %v214_v44 = vsel %vm26_vm5, %v212_v12, %v208_v35  ;;  %v226_v45 = vmul.f32 %v112_v27, %v112_v27 }
  0x9b   :  { %v217_v46 = vadd.f32 %v215_v40, %v207_v7  ;;  %v218_v47 = vadd.f32 %v216_v25, %v214_v44  ;;  %v223_v48 = vsub.f32 %v424_v2, %v430_v21  ;;  %v224_v0 = vsub.f32 %v426_v38, %v434_v39 }
  0x9c   :  { %v227_v49 = vsub.f32 %v183_v42, %v225_v41  ;;  %v228_v50 = vsub.f32 %v184_v43, %v226_v45  ;;  %v229_v51 = vmul.f32 %v111_v31, %v409_v17  ;;  %v245_v9 = vadd.f32 %v225_v41, %v430_v21 }
  0x9d   :  { %v219_v16 = vmul.f32 0.11111111, %v217_v46  ;;  %v246_v52 = vadd.f32 %v226_v45, %v434_v39  ;;  %v220_v24 = vmul.f32 0.11111111, %v218_v47  ;;  %v230_v3 = vmul.f32 %v112_v27, %v411_v18 }
  0x9e   :  { %v249_v53 = vadd.f32 %v227_v49, %v223_v48  ;;  %v250_v54 = vadd.f32 %v228_v50, %v224_v0  ;;  %v247_v55 = vadd.f32 0.0001, %v245_v9  ;;  %v233_v15 = vmul.f32 2.0, %v409_v17 }
  0x9f   :  { %v248_v12 = vadd.f32 0.0001, %v246_v52  ;;  %v231_v57 = vsub.f32 %v219_v16, %v229_v51  ;;  %v232_v38 = vsub.f32 %v220_v24, %v230_v3  ;;  %v234_v21 = vmul.f32 2.0, %v411_v18 }
  0xa0   :  { %v251_v2 = vadd.f32 0.0009, %v249_v53  ;;  %v252_v56 = vadd.f32 0.0009, %v250_v54  ;;  %v235_v61 = vmul.f32 %v233_v15, %v111_v31 }
  0xa1   :  { %v239_v60 = vmul.f32 2.0, %v231_v57  ;;  %v240_v39 = vmul.f32 2.0, %v232_v38  ;;  %v236_v26 = vmul.f32 %v234_v21, %v112_v27 }
  0xa2   :  { %v253_v58 = vmul.f32 %v251_v2, %v247_v55  ;;  %v254_v59 = vmul.f32 %v252_v56, %v248_v12  ;;  %v237_v4 = vadd.f32 0.0001, %v235_v61 }
  0xa3   :  { %v241_v62 = vadd.f32 0.0009, %v239_v60  ;;  %v242_v63 = vadd.f32 0.0009, %v240_v39  ;;  %v238_v5 = vadd.f32 0.0001, %v236_v26 }
  0xa4   :  { %275 = vrcp.f32 %v253_v58 }
  0xa5   :  { %277 = vrcp.f32 %v254_v59  ;;  %v243_v6 = vmul.f32 %v241_v62, %v237_v4  ;;  %v244_v10 = vmul.f32 %v242_v63, %v238_v5 }
  0xae   :  { %v276_v8 = vpop.eup %275 }
  0xaf   :  { %v278_v11 = vpop.eup %277  ;;  %v257_v13 = vmul.f32 %v276_v8, %v243_v6 }
  0xb0   :  { %v258_v14 = vmul.f32 %v278_v11, %v244_v10 }
  0xb1   :  { %v259_v19 = vsub.f32 1.0, %v257_v13 }
  0xb2   :  { %v260_v20 = vsub.f32 1.0, %v258_v14 }
  0xb3   :  { %v261_v17 = vmul.f32 0.5, %v259_v19 }
  0xb4   :  { %v262_v22 = vmul.f32 0.5, %v260_v20 }
  0xb5   :  { %v263_v23 = vmax.f32 %v261_v17, 0.0 }
  0xb6   :  { %v264_v28 = vmax.f32 %v262_v22, 0.0 }
  0xb7   :  { %v265_v18 = vmin.f32 %v263_v23, 1.0 }
  0xb8   :  { %v266_v30 = vmin.f32 %v264_v28, 1.0 }
  0xb9   :  { %267 = vst [vmem:[%s507_s2] sm:$0xff] %v265_v18 }
  0xba   :  { %268 = vst [vmem:[%s507_s2 + $0x8] sm:$0xff] %v266_v30 }

</bundles_post_ra>
